<compile_context>
chip_gen: v5e
topology: v5e:2x2
jax: 0.10.0
libtpu: 0.0.40
codegen_flags: <defaults>
</compile_context>

<pallas_src>
import functools

import jax
import jax.numpy as jnp
from jax.experimental import pallas as pl
from jax.experimental.pallas import tpu as pltpu


def _round_up(n, m):
    return ((n + m - 1) // m) * m


def _pick_tile_b(batch, max_tile=256):
    return min(max_tile, _round_up(batch, 8))


# ----------------------------------------------------------------------------
# Kernel 1: inference MLP forward  (linear1 -> sigmoid -> linear2)
# Output is lane-dense (Bpad, CPAD); wrapper slices back to (B, output_size).
# ----------------------------------------------------------------------------
def _mlp_kernel(x_ref, w1_ref, b1_ref, w2_ref, b2_ref, out_ref):
    h = jnp.dot(x_ref[...], w1_ref[...], preferred_element_type=jnp.float32)
    h = jax.nn.sigmoid(h + b1_ref[...])          # EUP path (no explicit divide)
    y = jnp.dot(h, w2_ref[...], preferred_element_type=jnp.float32)
    out_ref[...] = (y + b2_ref[...]).astype(out_ref.dtype)


def mlp_forward(x, w1, b1, w2p, b2p, num_classes):
    B, in_size = x.shape
    cpad = w2p.shape[1]
    tb = _pick_tile_b(B)
    bpad = _round_up(B, tb)
    if bpad != B:
        x = jnp.pad(x, ((0, bpad - B), (0, 0)))

    const = lambda i: (0, 0)
    out = pl.pallas_call(
        _mlp_kernel,
        out_shape=jax.ShapeDtypeStruct((bpad, cpad), jnp.float32),
        grid_spec=pltpu.PrefetchScalarGridSpec(
            num_scalar_prefetch=0,
            grid=(bpad // tb,),
            in_specs=[
                pl.BlockSpec((tb, in_size), lambda i: (i, 0)),
                pl.BlockSpec(w1.shape, const),
                pl.BlockSpec(b1.shape, const),
                pl.BlockSpec(w2p.shape, const),
                pl.BlockSpec(b2p.shape, const),
            ],
            out_specs=pl.BlockSpec((tb, cpad), lambda i: (i, 0)),
        ),
        compiler_params=pltpu.CompilerParams(
            dimension_semantics=("parallel",)),
    )(x, w1, b1, w2p, b2p)
    return out[:B, :num_classes]


# ----------------------------------------------------------------------------
# Kernel 2: fused MLP forward + cross-entropy (mean NLL over batch), matching
# nn.CrossEntropyLoss with integer class targets.  Labels arrive as (Bpad, 1)
# int32; the one-hot mask is built in-kernel from iota.  Padded class columns
# (>= num_classes) are excluded from the softmax, padded batch rows
# (>= batch_size) are excluded from the loss sum.
# ----------------------------------------------------------------------------
def _mlp_ce_kernel(x_ref, w1_ref, b1_ref, w2_ref, b2_ref, y_ref, loss_ref,
                   *, num_classes, batch_size, tile_b):
    i = pl.program_id(0)

    @pl.when(i == 0)
    def _():
        loss_ref[...] = jnp.zeros_like(loss_ref)

    h = jnp.dot(x_ref[...], w1_ref[...], preferred_element_type=jnp.float32)
    h = jax.nn.sigmoid(h + b1_ref[...])
    logits = jnp.dot(h, w2_ref[...], preferred_element_type=jnp.float32)
    logits = logits + b2_ref[...]                             # (tile_b, CPAD)

    tb, cpad = logits.shape
    col = jax.lax.broadcasted_iota(jnp.int32, (tb, cpad), 1)  # lane index
    valid_col = col < num_classes
    logits = jnp.where(valid_col, logits, jnp.float32(-1e30))  # mask pad cols

    m = jnp.max(logits, axis=-1, keepdims=True)               # (tile_b, 1)
    z = logits - m
    ez = jnp.where(valid_col, jnp.exp(z), 0.0)
    lse = jnp.log(jnp.sum(ez, axis=-1, keepdims=True))        # (tile_b, 1)

    labels = y_ref[...]                                       # (tile_b, 1)
    onehot = (col == labels).astype(jnp.float32)              # in-kernel 1-hot
    picked = jnp.sum(onehot * z, axis=-1, keepdims=True)      # z at label col

    nll = lse - picked                                        # (tile_b, 1)

    row = jax.lax.broadcasted_iota(jnp.int32, (tb, 1), 0) + i * tile_b
    valid_row = (row < batch_size).astype(jnp.float32)        # mask pad rows
    loss_ref[...] += jnp.sum(nll * valid_row, axis=0, keepdims=True)

    @pl.when(i == pl.num_programs(0) - 1)
    def _():
        loss_ref[...] = loss_ref[...] * (1.0 / jnp.float32(batch_size))


def mlp_ce_forward(x, w1, b1, w2p, b2p, y_int, num_classes):
    B, in_size = x.shape
    cpad = w2p.shape[1]
    tb = _pick_tile_b(B)
    bpad = _round_up(B, tb)
    y2d = y_int.astype(jnp.int32).reshape(B, 1)
    if bpad != B:
        x = jnp.pad(x, ((0, bpad - B), (0, 0)))
        y2d = jnp.pad(y2d, ((0, bpad - B), (0, 0)))

    const = lambda i: (0, 0)
    loss = pl.pallas_call(
        functools.partial(_mlp_ce_kernel, num_classes=num_classes,
                          batch_size=B, tile_b=tb),
        out_shape=jax.ShapeDtypeStruct((1, 1), jnp.float32),
        grid_spec=pltpu.PrefetchScalarGridSpec(
            num_scalar_prefetch=0,
            grid=(bpad // tb,),
            in_specs=[
                pl.BlockSpec((tb, in_size), lambda i: (i, 0)),
                pl.BlockSpec(w1.shape, const),
                pl.BlockSpec(b1.shape, const),
                pl.BlockSpec(w2p.shape, const),
                pl.BlockSpec(b2p.shape, const),
                pl.BlockSpec((tb, 1), lambda i: (i, 0)),
            ],
            out_specs=pl.BlockSpec((1, 1), const),   # resident accumulator
        ),
        compiler_params=pltpu.CompilerParams(
            dimension_semantics=("arbitrary",)),
    )(x, w1, b1, w2p, b2p, y2d)
    return loss[0, 0]


# ----------------------------------------------------------------------------
# Model wrapper mirroring torchModel.forward(x, y=None)
# ----------------------------------------------------------------------------
def init_params(key, input_size, hidden_size, output_size):
    k1, k2, k3, k4 = jax.random.split(key, 4)
    # PyTorch nn.Linear default init: U(-1/sqrt(fan_in), 1/sqrt(fan_in))
    lim1 = 1.0 / jnp.sqrt(jnp.float32(input_size))
    lim2 = 1.0 / jnp.sqrt(jnp.float32(hidden_size))
    w1 = jax.random.uniform(k1, (input_size, hidden_size), jnp.float32, -lim1, lim1)
    b1 = jax.random.uniform(k2, (1, hidden_size), jnp.float32, -lim1, lim1)
    w2 = jax.random.uniform(k3, (hidden_size, output_size), jnp.float32, -lim2, lim2)
    b2 = jax.random.uniform(k4, (1, output_size), jnp.float32, -lim2, lim2)
    # Pad the class dim to a 128-lane multiple once, at init (lane-dense MXU
    # output + unmasked stores).  Padded columns are zero and are masked out
    # of the softmax inside the CE kernel.
    cpad = _round_up(output_size, 128)
    w2p = jnp.zeros((hidden_size, cpad), jnp.float32).at[:, :output_size].set(w2)
    b2p = jnp.zeros((1, cpad), jnp.float32).at[:, :output_size].set(b2)
    return w1, b1, w2p, b2p


@functools.partial(jax.jit, static_argnames=("num_classes", "with_loss"))
def torch_model_forward(params, x, y=None, *, num_classes, with_loss=False):
    w1, b1, w2p, b2p = params
    if with_loss:
        return mlp_ce_forward(x, w1, b1, w2p, b2p, y, num_classes)
    return mlp_forward(x, w1, b1, w2p, b2p, num_classes)


if __name__ == "__main__":
    input_size, hidden_size, output_size = 32, 64, 16
    batch = 8

    key = jax.random.PRNGKey(0)
    k_param, k_x, k_y = jax.random.split(key, 3)
    params = init_params(k_param, input_size, hidden_size, output_size)

    x = jax.random.normal(k_x, (batch, input_size), jnp.float32)
    y = jax.random.randint(k_y, (batch,), 0, output_size, jnp.int32)

    # Inference path (y is None): returns logits (B, output_size)
    logits = torch_model_forward(params, x, num_classes=output_size,
                                 with_loss=False)
    jax.block_until_ready(logits)

    # Training path (y given): returns scalar cross-entropy loss (fused kernel)
    loss = torch_model_forward(params, x, y, num_classes=output_size,
                               with_loss=True)
    jax.block_until_ready(loss)

    # Sanity check against pure-JAX reference
    w1, b1, w2p, b2p = params
    w2 = w2p[:, :output_size]
    b2 = b2p[:, :output_size]
    h_ref = jax.nn.sigmoid(x @ w1 + b1)
    logits_ref = h_ref @ w2 + b2
    logp_ref = jax.nn.log_softmax(logits_ref, axis=-1)
    loss_ref = -jnp.mean(jnp.take_along_axis(logp_ref, y[:, None], axis=-1))
    assert logits.shape == (batch, output_size), "logits shape mismatch"
    assert jnp.allclose(logits, logits_ref, atol=1e-5), "logits mismatch"
    assert jnp.allclose(loss, loss_ref, atol=1e-5), "loss mismatch"

    print("KERNEL_OK")
</pallas_src>

<mosaic_0001>
module attributes {stable_mosaic.version = 11 : i64} {
  func.func @_mlp_kernel(%arg0: i32, %arg1: memref<8x32xf32, #tpu.memory_space<vmem>>, %arg2: memref<32x64xf32, #tpu.memory_space<vmem>>, %arg3: memref<1x64xf32, #tpu.memory_space<vmem>>, %arg4: memref<64x128xf32, #tpu.memory_space<vmem>>, %arg5: memref<1x128xf32, #tpu.memory_space<vmem>>, %arg6: memref<8x128xf32, #tpu.memory_space<vmem>>) attributes {dimension_semantics = [#tpu.dimension_semantics<parallel>], iteration_bounds = array<i64: 1>, scalar_prefetch = 0 : i64, scratch_operands = 0 : i64, tpu.core_type = #tpu.core_type<tc>, window_params = [{transform_indices = @transform_0, window_bounds = array<i64: 8, 32>}, {pipeline_mode = #tpu.pipeline_mode<synchronous>, transform_indices = @transform_1, window_bounds = array<i64: 32, 64>}, {pipeline_mode = #tpu.pipeline_mode<synchronous>, transform_indices = @transform_2, window_bounds = array<i64: 1, 64>}, {pipeline_mode = #tpu.pipeline_mode<synchronous>, transform_indices = @transform_3, window_bounds = array<i64: 64, 128>}, {pipeline_mode = #tpu.pipeline_mode<synchronous>, transform_indices = @transform_4, window_bounds = array<i64: 1, 128>}, {transform_indices = @transform_5, window_bounds = array<i64: 8, 128>}]} {
    %c0 = arith.constant 0 : index
    %c0_0 = arith.constant 0 : index
    %0 = vector.load %arg1[%c0, %c0_0] : memref<8x32xf32, #tpu.memory_space<vmem>>, vector<8x32xf32>
    %c0_1 = arith.constant 0 : index
    %c0_2 = arith.constant 0 : index
    %1 = vector.load %arg2[%c0_1, %c0_2] : memref<32x64xf32, #tpu.memory_space<vmem>>, vector<32x64xf32>
    %cst = arith.constant dense<0.000000e+00> : vector<8x64xf32>
    %2 = tpu.matmul %0, %1, %cst {dimension_numbers = #tpu.dot_dimension_numbers<[1], [0], [0], [1], [0, 0, 1, 1], [], []>} : vector<8x32xf32>, vector<32x64xf32>, vector<8x64xf32> -> vector<8x64xf32>
    %c0_3 = arith.constant 0 : index
    %c0_4 = arith.constant 0 : index
    %3 = vector.load %arg3[%c0_3, %c0_4] : memref<1x64xf32, #tpu.memory_space<vmem>>, vector<1x64xf32>
    %4 = vector.broadcast %3 : vector<1x64xf32> to vector<8x64xf32>
    %5 = arith.addf %2, %4 : vector<8x64xf32>
    %6 = arith.negf %5 : vector<8x64xf32>
    %7 = math.exp %6 : vector<8x64xf32>
    %cst_5 = arith.constant 1.000000e+00 : f32
    %8 = vector.broadcast %cst_5 : f32 to vector<8x64xf32>
    %9 = arith.addf %8, %7 : vector<8x64xf32>
    %10 = arith.divf %8, %9 : vector<8x64xf32>
    %c0_6 = arith.constant 0 : index
    %c0_7 = arith.constant 0 : index
    %11 = vector.load %arg4[%c0_6, %c0_7] : memref<64x128xf32, #tpu.memory_space<vmem>>, vector<64x128xf32>
    %cst_8 = arith.constant dense<0.000000e+00> : vector<8x128xf32>
    %12 = tpu.matmul %10, %11, %cst_8 {dimension_numbers = #tpu.dot_dimension_numbers<[1], [0], [0], [1], [0, 0, 1, 1], [], []>} : vector<8x64xf32>, vector<64x128xf32>, vector<8x128xf32> -> vector<8x128xf32>
    %c0_9 = arith.constant 0 : index
    %c0_10 = arith.constant 0 : index
    %13 = vector.load %arg5[%c0_9, %c0_10] : memref<1x128xf32, #tpu.memory_space<vmem>>, vector<1x128xf32>
    %14 = vector.broadcast %13 : vector<1x128xf32> to vector<8x128xf32>
    %15 = arith.addf %12, %14 : vector<8x128xf32>
    %c0_11 = arith.constant 0 : index
    %c0_12 = arith.constant 0 : index
    %16 = vector.load %arg6[%c0_11, %c0_12] : memref<8x128xf32, #tpu.memory_space<vmem>>, vector<8x128xf32>
    tpu.vector_store %arg6[%c0_11, %c0_12], %15 {strides = array<i32>} : memref<8x128xf32, #tpu.memory_space<vmem>>, vector<8x128xf32>,
    return
  }
  func.func @transform_0(%arg0: i32) -> (i32, i32) {
    %c0_i32 = arith.constant 0 : i32
    %c0_i32_0 = arith.constant 0 : i32
    return %arg0, %c0_i32 : i32, i32
  }
  func.func @transform_1(%arg0: i32) -> (i32, i32) {
    %c0_i32 = arith.constant 0 : i32
    %c0_i32_0 = arith.constant 0 : i32
    %c0_i32_1 = arith.constant 0 : i32
    return %c0_i32, %c0_i32_0 : i32, i32
  }
  func.func @transform_2(%arg0: i32) -> (i32, i32) {
    %c0_i32 = arith.constant 0 : i32
    %c0_i32_0 = arith.constant 0 : i32
    %c0_i32_1 = arith.constant 0 : i32
    return %c0_i32, %c0_i32_0 : i32, i32
  }
  func.func @transform_3(%arg0: i32) -> (i32, i32) {
    %c0_i32 = arith.constant 0 : i32
    %c0_i32_0 = arith.constant 0 : i32
    %c0_i32_1 = arith.constant 0 : i32
    return %c0_i32, %c0_i32_0 : i32, i32
  }
  func.func @transform_4(%arg0: i32) -> (i32, i32) {
    %c0_i32 = arith.constant 0 : i32
    %c0_i32_0 = arith.constant 0 : i32
    %c0_i32_1 = arith.constant 0 : i32
    return %c0_i32, %c0_i32_0 : i32, i32
  }
  func.func @transform_5(%arg0: i32) -> (i32, i32) {
    %c0_i32 = arith.constant 0 : i32
    %c0_i32_0 = arith.constant 0 : i32
    return %arg0, %c0_i32 : i32, i32
  }
}

</mosaic_0001>

<bundles_post_ra>
// kernel: torch_model_forward.1
= control target key start
LH: loop header
LB: loop body
LE: loop exit
PB: predicated region body
PF: predicated region fallthrough
CT: control target
= control target key end

     0   :  { %10 = vsyncpa [#allocation3], 0  ;;  %s387_s0 = inlined_call_operand.hbm [shape: f32[8,32], index: 0, kind: input, shape index: {}]   ;;  %s388_s1 = inlined_call_operand.hbm [shape: f32[32,64], index: 1, kind: input, shape index: {}]   ;;  %s389_s2 = inlined_call_operand.hbm [shape: f32[1,64], index: 2, kind: input, shape index: {}]   ;;  %s390_s3 = inlined_call_operand.hbm [shape: f32[64,128], index: 3, kind: input, shape index: {}]   ;;  %s391_s4 = inlined_call_operand.vmem [shape: f32[1,128], index: 4, kind: input, shape index: {}]   ;;  %s392_s5 = inlined_call_operand.hbm [shape: f32[8,128], index: 5, kind: output, shape index: {}]  }
   0x1   :  { %11 = vsyncpa [#allocation6], 0 }
   0x2   :  { %12 = vsyncpa [#allocation9], 0  ;;  %s29_s20 = sshll.u32 %s388_s1, 4  ;;  %s30_s20 = int_to_ptr.hbm [resolvable:$true] %s29_s20 }
   0x3   :  { %13 = vsyncpa [#allocation4], 0  ;;  %s332_s21 = smov [#allocation5]   ;;  %s19_s25 = sshll.u32 %s387_s0, 4  ;;  %s20_s25 = int_to_ptr.hbm [resolvable:$true] %s19_s25 }
   0x4   :  { %s31_s22 = sshll.u32 %s332_s21, 4  ;;  %s333_s26 = smov 128   ;;  %s32_s22 = int_to_ptr.vmem [resolvable:$true] %s31_s22 }
   0x5   :  { %s334_s27 = smov 8   ;;  %s335_s28 = smov [#allocation2]  }
   0x6   :  { %37 = dma.hbm_to_vmem [thread:$0]  %s30_s20, 512, %s32_s22, [#allocation6], %s333_s26, %s333_s26, %s334_s27  }
   0x7   :  { %s21_s29 = sshll.u32 %s335_s28, 4  ;;  %s43_s7 = sshll.u32 %s389_s2, 4  ;;  %s22_s29 = int_to_ptr.vmem [resolvable:$true] %s21_s29  ;;  %s44_s7 = int_to_ptr.hbm [resolvable:$true] %s43_s7 }
   0x8   :  { %24 = dma.hbm_to_vmem [thread:$0]  %s20_s25, 128, %s22_s29, [#allocation3]  }
   0x9   :  { %s53_s9 = sshll.u32 %s390_s3, 4  ;;  %s336_s10 = smov [#allocation7]   ;;  %s54_s9 = int_to_ptr.hbm [resolvable:$true] %s53_s9 }
   0xa   :  { %s45_s11 = sshll.u32 %s336_s10, 4  ;;  %s337_s0 = smov [#allocation8]   ;;  %s46_s11 = int_to_ptr.vmem [resolvable:$true] %s45_s11 }
   0xb   :  { %48 = dma.hbm_to_vmem [thread:$0]  %s44_s7, 16, %s46_s11, [#allocation6]  }
   0xc   :  { %s55_s12 = sshll.u32 %s337_s0, 4  ;;  %s56_s12 = int_to_ptr.vmem [resolvable:$true] %s55_s12 }
   0xd   :  { %61 = dma.hbm_to_vmem [thread:$0]  %s54_s9, 1024, %s56_s12, [#allocation9], %s333_s26, %s333_s26, %s334_s27  }
   0xe   :  { %324 = dma.done.wait [#allocation3], 128  }
   0xf   :  { %325 = vsyncadd [#allocation3], 4294967168 }
  0x10   :  { %326 = dma.done.wait [#allocation6], 528  }
  0x11   :  { %327 = vsyncadd [#allocation6], 4294966768 }
  0x12   :  { %328 = dma.done.wait [#allocation9], 1024  }
  0x13   :  { %329 = vsyncadd [#allocation9], 4294966272  ;;  %v84_v0 = vld [vmem:[#allocation5 + $0x18] sm:$0xff]  ;;  %v83_v1 = vld [vmem:[#allocation5 + $0x10] sm:$0xff]  ;;  %vm89_vm0 = vcmask 261120   ;;  %vm144_vm4 = vcmask 523264  }
  0x14   :  { %105 = vmatpush.msra.mxu0 %v84_v0  ;;  %v82_v2 = vld [vmem:[#allocation5 + $0x8] sm:$0xff]  ;;  %v81_v3 = vld [vmem:[#allocation5] sm:$0xff]  ;;  %v80_v4 = vld [vmem:[#allocation2] sm:$0xff]  ;;  %s338_s13 = smov [#allocation10]   ;;  %s176_s17 = sshll.u32 %s392_s5, 4  ;;  %s177_s17 = int_to_ptr.hbm [resolvable:$true] %s176_s17 }
  0x15   :  { %v139_v5 = vld [vmem:[#allocation8 + $0x38] sm:$0xff]  ;;  %v138_v6 = vld [vmem:[#allocation8 + $0x30] sm:$0xff]  ;;  %v137_v7 = vld [vmem:[#allocation8 + $0x28] sm:$0xff]  ;;  %s174_s14 = sshll.u32 %s338_s13, 4  ;;  %s175_s14 = int_to_ptr.vmem [resolvable:$true] %s174_s14 }
  0x16   :  { %106 = vmatpush.msra.mxu0 %v83_v1  ;;  %156 = vmatpush.msra.mxu1 %v139_v5  ;;  %v136_v8 = vld [vmem:[#allocation8 + $0x20] sm:$0xff]  ;;  %v135_v9 = vld [vmem:[#allocation8 + $0x18] sm:$0xff]  ;;  %v134_v10 = vld [vmem:[#allocation8 + $0x10] sm:$0xff] }
  0x17   :  { %v133_v11 = vld [vmem:[#allocation8 + $0x8] sm:$0xff]  ;;  %v132_v12 = vld [vmem:[#allocation8] sm:$0xff]  ;;  %v198_v13 = vld [vmem:[#allocation7] ss:$0 sm:$0xff] }
  0x18   :  { %107 = vmatpush.msra.mxu0 %v82_v2  ;;  %157 = vmatpush.msra.mxu1 %v138_v6  ;;  %v199_v29 = vld [vmem:[%s391_s4] ss:$0 sm:$0xff] }
  0x1a   :  { %108 = vmatpush.msra.mxu0 %v81_v3  ;;  %158 = vmatpush.msra.mxu1 %v137_v7 }
  0x1b   :  { %188 = vmatmul.msk.f32.vlgmr.msra.gmra.mxu0 %vm89_vm0, %v80_v4 }
  0x1c   :  { %159 = vmatpush.msra.mxu1 %v136_v8 }
  0x1e   :  { %160 = vmatpush.msra.mxu1 %v135_v9 }
  0x20   :  { %161 = vmatpush.msra.mxu1 %v134_v10 }
  0x22   :  { %162 = vmatpush.msra.mxu1 %v133_v11 }
  0x24   :  { %163 = vmatpush.msra.mxu1 %v132_v12 }
  0x98   :  { %v110_v14 = vpop.f32.mrf.mxu0 }
  0x99   :  { %v111_v15 = vadd.f32 %v198_v13, %v110_v14 }
  0x9b   :  { %v189_v16 = vmul.f32 -1.442695, %v111_v15 }
  0x9d   :  { %200 = vpow2.f32 %v189_v16 }
  0xa3   :  { %v201_v17 = vpop.eup %200 }
  0xa4   :  { %v116_v18 = vadd.f32 1.0, %v201_v17 }
  0xa6   :  { %202 = vrcp.f32 %v116_v18  ;;  %v128_v22 = vand.u32 2147483648, %v116_v18  ;;  %v126_v24 = vand.u32 2147483647, %v116_v18  ;;  %vm122_vm2 = vweird.f32 %v116_v18 }
  0xa8   :  { %v129_v26 = vor.u32 1.1754944e-38, %v128_v22  ;;  %vm127_vm5 = vcmp.eq.f32.partialorder %v126_v24, 8.507059e+37 }
  0xac   :  { %v203_v19 = vpop.eup %202 }
  0xad   :  { %v118_v20 = vmul.f32 %v203_v19, %v116_v18  ;;  %vm123_vm1 = vweird.f32 %v203_v19 }
  0xae   :  { %vm124_vm3 = vmor %vm122_vm2, %vm123_vm1 }
  0xaf   :  { %v119_v21 = vsub.f32 1.0, %v118_v20 }
  0xb1   :  { %v120_v23 = vmul.f32 %v203_v19, %v119_v21 }
  0xb3   :  { %v121_v25 = vadd.f32 %v203_v19, %v120_v23 }
  0xb5   :  { %v125_v27 = vsel %vm124_vm3, %v203_v19, %v121_v25 }
  0xb6   :  { %v130_v28 = vsel %vm127_vm5, %v129_v26, %v125_v27 }
  0xb7   :  { %190 = vmatmul.msk.f32.vlgmr.msra.gmra.mxu1 %vm144_vm4, %v130_v28 }
 0x134   :  { %v165_v30 = vpop.f32.mrf.mxu1 }
 0x135   :  { %v166_v31 = vadd.f32 %v199_v29, %v165_v30 }
 0x137   :  { %168 = vst [vmem:[#allocation10] sm:$0xff] %v166_v31 }
 0x138   :  { %179 = dma.vmem_to_hbm [thread:$0]  %s175_s14, 128, %s177_s17, [#allocation4]  }
 0x139   :  { %330 = dma.done.wait [#allocation4], 128  }
 0x13a   :  { %331 = vsyncadd [#allocation4], 4294967168 }
 0x13b   :  { %184 = vsyncpa [#allocation3], 1 }
 0x13c   :  { %185 = vsyncpa [#allocation6], 1 }
 0x13d   :  { %186 = vsyncpa [#allocation9], 1 }
 0x13e   :  { %187 = vsyncpa [#allocation4], 1 }

</bundles_post_ra>
